<compile_context>
chip_gen: v7x
topology: tpu7x:2x2x1
jax: 0.10.0
libtpu: 0.0.40
codegen_flags: <defaults>
</compile_context>

<pallas_src>
import functools
from typing import Any, NamedTuple, Optional

import jax
import jax.numpy as jnp
from jax.experimental import pallas as pl
from jax.experimental.pallas import tpu as pltpu

LANE = 128
SUBLANE = 8
NEG_BIG = -1e30  # padded output lanes: exp(NEG_BIG - m) underflows to 0.0 in f32


def _round_up(x, m):
    return (x + m - 1) // m * m


def _vmem_capacity_bytes():
    """Per-TensorCore VMEM capacity; conservative 64 MiB (v7x) fallback."""
    try:
        return int(pltpu.get_tpu_info().vmem_capacity_bytes)
    except Exception:
        return 64 << 20


class PackedParams(NamedTuple):
    num_layers: int
    hidden_size: int
    out_size: int
    out_pad: int
    mxu_dtype: Any
    w_hid: Optional[jax.Array]   # (L, H, H) in mxu_dtype, None when L == 0
    b_hid: Optional[jax.Array]   # (L, 1, H) float32, None when L == 0
    w_fin: jax.Array             # (H, O_pad) in mxu_dtype (zero-padded columns)
    b_fin: jax.Array             # (1, O_pad) float32 (padded lanes = NEG_BIG)


def pack_params(params, mxu_dtype=jnp.bfloat16):
    """params: flat list [W0, b0, ..., Wf, bf] with W:(in,out), b:(1,out), float32.

    Packs hidden layers into stacked arrays, converts weights to the MXU input dtype
    once (not per call), and lane-pads the output dimension to a multiple of 128.
    """
    num_layers = len(params) // 2 - 1
    hidden = params[-2].shape[0]
    out = params[-1].shape[-1]
    out_pad = _round_up(out, LANE)

    if num_layers > 0:
        w_hid = jnp.stack([params[2 * i] for i in range(num_layers)]).astype(mxu_dtype)
        b_hid = jnp.stack(
            [params[2 * i + 1].reshape(1, hidden) for i in range(num_layers)]
        ).astype(jnp.float32)
    else:
        w_hid = None
        b_hid = None

    wf = params[2 * num_layers].astype(mxu_dtype)
    bf = params[2 * num_layers + 1].reshape(1, out).astype(jnp.float32)
    w_fin = jnp.zeros((hidden, out_pad), mxu_dtype).at[:, :out].set(wf)
    b_fin = jnp.full((1, out_pad), NEG_BIG, jnp.float32).at[:, :out].set(bf)

    return PackedParams(num_layers, hidden, out, out_pad, mxu_dtype,
                        w_hid, b_hid, w_fin, b_fin)


def _mlp_logsoftmax_kernel(num_layers, mxu_dtype, *refs):
    """refs = (x, [w_hid, b_hid,] w_fin, b_fin, out)."""
    if num_layers > 0:
        x_ref, w_hid_ref, b_hid_ref, w_fin_ref, b_fin_ref, o_ref = refs
    else:
        x_ref, w_fin_ref, b_fin_ref, o_ref = refs

    # x arrives already in the MXU streaming dtype (bf16 on the perf path, f32 on the
    # exact path).  Accumulation, bias-add, ReLU and log-softmax stay f32.
    h = x_ref[...]

    # Hidden layers: Linear(H, H) + ReLU  (Dropout p=0 -> identity).
    for i in range(num_layers):
        h = jnp.dot(h.astype(mxu_dtype), w_hid_ref[i],
                    preferred_element_type=jnp.float32) + b_hid_ref[i]
        h = jnp.maximum(h, 0.0)

    # Final Linear(H, O_pad); padded columns carry bias NEG_BIG.
    logits = jnp.dot(h.astype(mxu_dtype), w_fin_ref[...],
                     preferred_element_type=jnp.float32) + b_fin_ref[...]

    # LogSoftmax(dim=-1), numerically stable; padded lanes contribute exp(.)=0.
    m = jnp.max(logits, axis=-1, keepdims=True)
    shifted = logits - m
    lse = jnp.log(jnp.sum(jnp.exp(shifted), axis=-1, keepdims=True))
    o_ref[...] = (shifted - lse).astype(o_ref.dtype)


def triple_validator_forward(x, packed: PackedParams, *, batch_tile=None):
    """x: (B, H) float32.  Returns (B, O) float32 log-probabilities."""
    B, H = x.shape
    assert H == packed.hidden_size
    L, O, O_pad = packed.num_layers, packed.out_size, packed.out_pad

    # Stream activations in the MXU dtype (bf16 halves x's HBM read bytes; the kernel
    # cast at the first dot anyway, so numerics are unchanged vs the previous version).
    x = x.astype(packed.mxu_dtype)
    x_itemsize = x.dtype.itemsize
    w_itemsize = packed.w_fin.dtype.itemsize

    vmem_cap = _vmem_capacity_bytes()
    vmem_budget = int(0.8 * vmem_cap)          # valid on v7x (64 MiB) and v5e/v6e (128 MiB)
    slack = 8 << 20

    # Resident (single-buffered) parameter footprint.
    weight_bytes = H * O_pad * w_itemsize + O_pad * 4
    if L > 0:
        weight_bytes += L * H * H * w_itemsize + L * H * 4

    def dyn_bytes(tm):
        # double-buffered x block + double-buffered f32 output block + f32 temporaries
        return 2 * tm * H * x_itemsize + 2 * tm * O_pad * 4 + 4 * tm * H * 4

    # Batch tile: big enough to amortize the ~0.35us / ~600-cycle per-grid-step cost
    # (small-H blocks are tiny), clamped by batch size and VMEM budget.
    if batch_tile is not None:
        tm = _round_up(batch_tile, SUBLANE)
    elif H <= 512:
        tm = 1024
    elif H <= 2048:
        tm = 512
    else:
        tm = 256
    tm = max(SUBLANE, min(tm, _round_up(B, SUBLANE)))
    tm = _round_up(tm, SUBLANE)
    while tm > SUBLANE and weight_bytes + dyn_bytes(tm) + slack > vmem_budget:
        tm = max(SUBLANE, _round_up(tm // 2, SUBLANE))

    b_pad = _round_up(B, tm)
    # v7x megacore: guarantee >=2 grid steps when the batch allows it so the "parallel"
    # batch axis can be sharded across both TensorCores (no effect on v5e/v6e).
    if b_pad // tm == 1 and b_pad >= 2 * SUBLANE:
        tm = _round_up(b_pad // 2, SUBLANE)
        b_pad = _round_up(B, tm)

    if b_pad != B:
        x = jnp.pad(x, ((0, b_pad - B), (0, 0)))

    grid = (b_pad // tm,)

    def _vmem_limit(weight_buffers):
        need = weight_buffers * weight_bytes + dyn_bytes(tm) + slack
        return min(max(need, 32 << 20), vmem_budget)

    kernel = functools.partial(_mlp_logsoftmax_kernel, L, packed.mxu_dtype)

    def _run(single_buffer_resident):
        # Grid-invariant parameter blocks: fetched once, stay resident; single-buffering
        # avoids paying a 2x VMEM footprint for blocks whose index never changes.
        res = {"pipeline_mode": pl.Buffered(1)} if single_buffer_resident else {}

        in_arrays = [x]
        in_specs = [pl.BlockSpec((tm, H), lambda i: (i, 0))]
        if L > 0:
            in_arrays.extend([packed.w_hid, packed.b_hid])
            in_specs.extend([
                pl.BlockSpec((L, H, H), lambda i: (0, 0, 0), **res),
                pl.BlockSpec((L, 1, H), lambda i: (0, 0, 0), **res),
            ])
        in_arrays.extend([packed.w_fin, packed.b_fin])
        in_specs.extend([
            pl.BlockSpec((H, O_pad), lambda i: (0, 0), **res),
            pl.BlockSpec((1, O_pad), lambda i: (0, 0), **res),
        ])

        # Lane-dense (tm, 128) store (unmasked vst); wrapper slices [:, :O].
        out_spec = pl.BlockSpec((tm, O_pad), lambda i: (i, 0))

        return pl.pallas_call(
            kernel,
            out_shape=jax.ShapeDtypeStruct((b_pad, O_pad), jnp.float32),
            grid=grid,
            in_specs=in_specs,
            out_specs=out_spec,
            compiler_params=pltpu.CompilerParams(
                dimension_semantics=("parallel",),   # batch axis -> both TCs on v7x
                vmem_limit_bytes=_vmem_limit(1 if single_buffer_resident else 2),
            ),
        )(*in_arrays)

    try:
        out = _run(True)
    except Exception:
        # Fallback: default double-buffering if Buffered(1) is unsupported on this stack.
        out = _run(False)

    return out[:B, :O]


def init_params(key, num_layers, hidden_size, output_size):
    """Deterministic synthetic params.  Weights (in, out); biases (1, out)."""
    params = []
    dims = [(hidden_size, hidden_size)] * num_layers + [(hidden_size, output_size)]
    for (fan_in, fan_out) in dims:
        key, kw, kb = jax.random.split(key, 3)
        bound = 1.0 / jnp.sqrt(fan_in)
        w = jax.random.uniform(kw, (fan_in, fan_out), jnp.float32, -bound, bound)
        b = jax.random.uniform(kb, (1, fan_out), jnp.float32, -bound, bound)
        params += [w, b]
    return params


def reference_forward(x, params):
    num_layers = len(params) // 2 - 1
    h = x
    for i in range(num_layers):
        h = jnp.maximum(h @ params[2 * i] + params[2 * i + 1], 0.0)
    logits = h @ params[2 * num_layers] + params[2 * num_layers + 1]
    return jax.nn.log_softmax(logits, axis=-1)


if __name__ == "__main__":
    # TripleValidator(num_layers=2, hidden_size=32, output_size=8, dropout=0.0, batch_norm=False)
    num_layers, hidden_size, output_size = 2, 32, 8
    batch = 2

    key = jax.random.PRNGKey(0)
    key, kx = jax.random.split(key)
    x = jax.random.normal(kx, (batch, hidden_size), jnp.float32)
    params = init_params(key, num_layers, hidden_size, output_size)

    ref = reference_forward(x, params)

    # Exact f32-MXU path: tight check of the packed / padded / tiled kernel structure.
    packed_f32 = pack_params(params, mxu_dtype=jnp.float32)
    out_f32 = jax.block_until_ready(triple_validator_forward(x, packed_f32))
    assert out_f32.shape == (batch, output_size)
    assert jnp.allclose(out_f32, ref, atol=1e-5, rtol=1e-5), "f32 path mismatch vs reference"

    # bf16-MXU / bf16-streamed-activation perf path (f32 accumulate + epilogue).
    packed_bf16 = pack_params(params, mxu_dtype=jnp.bfloat16)
    out_bf16 = jax.block_until_ready(triple_validator_forward(x, packed_bf16))
    assert out_bf16.shape == (batch, output_size)
    assert jnp.allclose(out_bf16, ref, atol=1e-1, rtol=5e-2), "bf16 path mismatch vs reference"

    # Multi-step grid (>=2 tiles) exercises the single-buffered resident weights,
    # batch padding and the megacore-friendly tiling path.
    big_batch = 300
    key, kb = jax.random.split(key)
    xb = jax.random.normal(kb, (big_batch, hidden_size), jnp.float32)
    refb = reference_forward(xb, params)

    outb_f32 = jax.block_until_ready(triple_validator_forward(xb, packed_f32))
    assert outb_f32.shape == (big_batch, output_size)
    assert jnp.allclose(outb_f32, refb, atol=1e-4, rtol=1e-4), "multi-tile f32 mismatch"

    outb_bf16 = jax.block_until_ready(triple_validator_forward(xb, packed_bf16))
    assert outb_bf16.shape == (big_batch, output_size)
    assert jnp.allclose(outb_bf16, refb, atol=2e-1, rtol=5e-2), "multi-tile bf16 mismatch"

    print("KERNEL_OK")
</pallas_src>

<mosaic_0001>
module attributes {stable_mosaic.version = 11 : i64} {
  func.func @_mlp_logsoftmax_kernel(%arg0: i32, %arg1: memref<8x32xf32, #tpu.memory_space<vmem>>, %arg2: memref<2x32x32xf32, #tpu.memory_space<vmem>>, %arg3: memref<2x1x32xf32, #tpu.memory_space<vmem>>, %arg4: memref<32x128xf32, #tpu.memory_space<vmem>>, %arg5: memref<1x128xf32, #tpu.memory_space<vmem>>, %arg6: memref<8x128xf32, #tpu.memory_space<vmem>>) attributes {dimension_semantics = [#tpu.dimension_semantics<parallel>], iteration_bounds = array<i64: 1>, scalar_prefetch = 0 : i64, scratch_operands = 0 : i64, tpu.core_type = #tpu.core_type<tc>, window_params = [{transform_indices = @transform_0, window_bounds = array<i64: 8, 32>}, {pipeline_mode = #tpu.pipeline_mode<synchronous>, transform_indices = @transform_1, window_bounds = array<i64: 2, 32, 32>}, {pipeline_mode = #tpu.pipeline_mode<synchronous>, transform_indices = @transform_2, window_bounds = array<i64: 2, 1, 32>}, {pipeline_mode = #tpu.pipeline_mode<synchronous>, transform_indices = @transform_3, window_bounds = array<i64: 32, 128>}, {pipeline_mode = #tpu.pipeline_mode<synchronous>, transform_indices = @transform_4, window_bounds = array<i64: 1, 128>}, {transform_indices = @transform_5, window_bounds = array<i64: 8, 128>}]} {
    %c0 = arith.constant 0 : index
    %c0_0 = arith.constant 0 : index
    %0 = vector.load %arg1[%c0, %c0_0] : memref<8x32xf32, #tpu.memory_space<vmem>>, vector<8x32xf32>
    %c0_1 = arith.constant 0 : index
    %c0_2 = arith.constant 0 : index
    %c0_3 = arith.constant 0 : index
    %1 = vector.load %arg2[%c0_1, %c0_2, %c0_3] : memref<2x32x32xf32, #tpu.memory_space<vmem>>, vector<1x32x32xf32>
    %2 = vector.shape_cast %1 : vector<1x32x32xf32> to vector<32x32xf32>
    %cst = arith.constant dense<0.000000e+00> : vector<8x32xf32>
    %3 = tpu.matmul %0, %2, %cst {dimension_numbers = #tpu.dot_dimension_numbers<[1], [0], [0], [1], [0, 0, 1, 1], [], []>} : vector<8x32xf32>, vector<32x32xf32>, vector<8x32xf32> -> vector<8x32xf32>
    %c0_4 = arith.constant 0 : index
    %c0_5 = arith.constant 0 : index
    %c0_6 = arith.constant 0 : index
    %4 = vector.load %arg3[%c0_4, %c0_5, %c0_6] : memref<2x1x32xf32, #tpu.memory_space<vmem>>, vector<1x1x32xf32>
    %5 = vector.shape_cast %4 : vector<1x1x32xf32> to vector<1x32xf32>
    %6 = vector.broadcast %5 : vector<1x32xf32> to vector<8x32xf32>
    %7 = arith.addf %3, %6 : vector<8x32xf32>
    %cst_7 = arith.constant 0.000000e+00 : f32
    %8 = vector.broadcast %cst_7 : f32 to vector<8x32xf32>
    %9 = arith.maximumf %7, %8 : vector<8x32xf32>
    %c1 = arith.constant 1 : index
    %c0_8 = arith.constant 0 : index
    %c0_9 = arith.constant 0 : index
    %10 = vector.load %arg2[%c1, %c0_8, %c0_9] : memref<2x32x32xf32, #tpu.memory_space<vmem>>, vector<1x32x32xf32>
    %11 = vector.shape_cast %10 : vector<1x32x32xf32> to vector<32x32xf32>
    %cst_10 = arith.constant dense<0.000000e+00> : vector<8x32xf32>
    %12 = tpu.matmul %9, %11, %cst_10 {dimension_numbers = #tpu.dot_dimension_numbers<[1], [0], [0], [1], [0, 0, 1, 1], [], []>} : vector<8x32xf32>, vector<32x32xf32>, vector<8x32xf32> -> vector<8x32xf32>
    %c1_11 = arith.constant 1 : index
    %c0_12 = arith.constant 0 : index
    %c0_13 = arith.constant 0 : index
    %13 = vector.load %arg3[%c1_11, %c0_12, %c0_13] : memref<2x1x32xf32, #tpu.memory_space<vmem>>, vector<1x1x32xf32>
    %14 = vector.shape_cast %13 : vector<1x1x32xf32> to vector<1x32xf32>
    %15 = vector.broadcast %14 : vector<1x32xf32> to vector<8x32xf32>
    %16 = arith.addf %12, %15 : vector<8x32xf32>
    %cst_14 = arith.constant 0.000000e+00 : f32
    %17 = vector.broadcast %cst_14 : f32 to vector<8x32xf32>
    %18 = arith.maximumf %16, %17 : vector<8x32xf32>
    %c0_15 = arith.constant 0 : index
    %c0_16 = arith.constant 0 : index
    %19 = vector.load %arg4[%c0_15, %c0_16] : memref<32x128xf32, #tpu.memory_space<vmem>>, vector<32x128xf32>
    %cst_17 = arith.constant dense<0.000000e+00> : vector<8x128xf32>
    %20 = tpu.matmul %18, %19, %cst_17 {dimension_numbers = #tpu.dot_dimension_numbers<[1], [0], [0], [1], [0, 0, 1, 1], [], []>} : vector<8x32xf32>, vector<32x128xf32>, vector<8x128xf32> -> vector<8x128xf32>
    %c0_18 = arith.constant 0 : index
    %c0_19 = arith.constant 0 : index
    %21 = vector.load %arg5[%c0_18, %c0_19] : memref<1x128xf32, #tpu.memory_space<vmem>>, vector<1x128xf32>
    %22 = vector.broadcast %21 : vector<1x128xf32> to vector<8x128xf32>
    %23 = arith.addf %20, %22 : vector<8x128xf32>
    %cst_20 = arith.constant dense<0xFF800000> : vector<8xf32>
    %24 = vector.multi_reduction <maximumf>, %23, %cst_20 [1] : vector<8x128xf32> to vector<8xf32>
    %25 = vector.shape_cast %24 : vector<8xf32> to vector<8x1xf32>
    %26 = vector.broadcast %25 : vector<8x1xf32> to vector<8x128xf32>
    %27 = arith.subf %23, %26 : vector<8x128xf32>
    %28 = math.exp %27 : vector<8x128xf32>
    %cst_21 = arith.constant dense<0.000000e+00> : vector<8xf32>
    %29 = vector.multi_reduction <add>, %28, %cst_21 [1] : vector<8x128xf32> to vector<8xf32>
    %30 = vector.shape_cast %29 : vector<8xf32> to vector<8x1xf32>
    %31 = math.log %30 : vector<8x1xf32>
    %32 = vector.broadcast %31 : vector<8x1xf32> to vector<8x128xf32>
    %33 = arith.subf %27, %32 : vector<8x128xf32>
    %c0_22 = arith.constant 0 : index
    %c0_23 = arith.constant 0 : index
    %34 = vector.load %arg6[%c0_22, %c0_23] : memref<8x128xf32, #tpu.memory_space<vmem>>, vector<8x128xf32>
    tpu.vector_store %arg6[%c0_22, %c0_23], %33 {strides = array<i32>} : memref<8x128xf32, #tpu.memory_space<vmem>>, vector<8x128xf32>,
    return
  }
  func.func @transform_0(%arg0: i32) -> (i32, i32) {
    %c0_i32 = arith.constant 0 : i32
    %c0_i32_0 = arith.constant 0 : i32
    return %arg0, %c0_i32 : i32, i32
  }
  func.func @transform_1(%arg0: i32) -> (i32, i32, i32) {
    %c0_i32 = arith.constant 0 : i32
    %c0_i32_0 = arith.constant 0 : i32
    %c0_i32_1 = arith.constant 0 : i32
    %c0_i32_2 = arith.constant 0 : i32
    return %c0_i32, %c0_i32_0, %c0_i32_1 : i32, i32, i32
  }
  func.func @transform_2(%arg0: i32) -> (i32, i32, i32) {
    %c0_i32 = arith.constant 0 : i32
    %c0_i32_0 = arith.constant 0 : i32
    %c0_i32_1 = arith.constant 0 : i32
    %c0_i32_2 = arith.constant 0 : i32
    return %c0_i32, %c0_i32_0, %c0_i32_1 : i32, i32, i32
  }
  func.func @transform_3(%arg0: i32) -> (i32, i32) {
    %c0_i32 = arith.constant 0 : i32
    %c0_i32_0 = arith.constant 0 : i32
    %c0_i32_1 = arith.constant 0 : i32
    return %c0_i32, %c0_i32_0 : i32, i32
  }
  func.func @transform_4(%arg0: i32) -> (i32, i32) {
    %c0_i32 = arith.constant 0 : i32
    %c0_i32_0 = arith.constant 0 : i32
    %c0_i32_1 = arith.constant 0 : i32
    return %c0_i32, %c0_i32_0 : i32, i32
  }
  func.func @transform_5(%arg0: i32) -> (i32, i32) {
    %c0_i32 = arith.constant 0 : i32
    %c0_i32_0 = arith.constant 0 : i32
    return %arg0, %c0_i32 : i32, i32
  }
}

module attributes {stable_mosaic.version = 11 : i64} {
  func.func @_mlp_logsoftmax_kernel(%arg0: i32, %arg1: memref<8x32xf32, #tpu.memory_space<vmem>>, %arg2: memref<2x32x32xf32, #tpu.memory_space<vmem>>, %arg3: memref<2x1x32xf32, #tpu.memory_space<vmem>>, %arg4: memref<32x128xf32, #tpu.memory_space<vmem>>, %arg5: memref<1x128xf32, #tpu.memory_space<vmem>>, %arg6: memref<8x128xf32, #tpu.memory_space<vmem>>) attributes {dimension_semantics = [#tpu.dimension_semantics<parallel>], iteration_bounds = array<i64: 1>, scalar_prefetch = 0 : i64, scratch_operands = 0 : i64, tpu.core_type = #tpu.core_type<tc>, window_params = [{transform_indices = @transform_0, window_bounds = array<i64: 8, 32>}, {pipeline_mode = #tpu.pipeline_mode<synchronous>, transform_indices = @transform_1, window_bounds = array<i64: 2, 32, 32>}, {pipeline_mode = #tpu.pipeline_mode<synchronous>, transform_indices = @transform_2, window_bounds = array<i64: 2, 1, 32>}, {pipeline_mode = #tpu.pipeline_mode<synchronous>, transform_indices = @transform_3, window_bounds = array<i64: 32, 128>}, {pipeline_mode = #tpu.pipeline_mode<synchronous>, transform_indices = @transform_4, window_bounds = array<i64: 1, 128>}, {transform_indices = @transform_5, window_bounds = array<i64: 8, 128>}]} {
    %c0 = arith.constant 0 : index
    %c0_0 = arith.constant 0 : index
    %0 = vector.load %arg1[%c0, %c0_0] : memref<8x32xf32, #tpu.memory_space<vmem>>, vector<8x32xf32>
    %c0_1 = arith.constant 0 : index
    %c0_2 = arith.constant 0 : index
    %c0_3 = arith.constant 0 : index
    %1 = vector.load %arg2[%c0_1, %c0_2, %c0_3] : memref<2x32x32xf32, #tpu.memory_space<vmem>>, vector<1x32x32xf32>
    %2 = vector.shape_cast %1 : vector<1x32x32xf32> to vector<32x32xf32>
    %cst = arith.constant dense<0.000000e+00> : vector<8x32xf32>
    %3 = tpu.matmul %0, %2, %cst {dimension_numbers = #tpu.dot_dimension_numbers<[1], [0], [0], [1], [0, 0, 1, 1], [], []>} : vector<8x32xf32>, vector<32x32xf32>, vector<8x32xf32> -> vector<8x32xf32>
    %c0_4 = arith.constant 0 : index
    %c0_5 = arith.constant 0 : index
    %c0_6 = arith.constant 0 : index
    %4 = vector.load %arg3[%c0_4, %c0_5, %c0_6] : memref<2x1x32xf32, #tpu.memory_space<vmem>>, vector<1x1x32xf32>
    %5 = vector.shape_cast %4 : vector<1x1x32xf32> to vector<1x32xf32>
    %6 = vector.broadcast %5 : vector<1x32xf32> to vector<8x32xf32>
    %7 = arith.addf %3, %6 : vector<8x32xf32>
    %cst_7 = arith.constant 0.000000e+00 : f32
    %8 = vector.broadcast %cst_7 : f32 to vector<8x32xf32>
    %9 = arith.maximumf %7, %8 : vector<8x32xf32>
    %c1 = arith.constant 1 : index
    %c0_8 = arith.constant 0 : index
    %c0_9 = arith.constant 0 : index
    %10 = vector.load %arg2[%c1, %c0_8, %c0_9] : memref<2x32x32xf32, #tpu.memory_space<vmem>>, vector<1x32x32xf32>
    %11 = vector.shape_cast %10 : vector<1x32x32xf32> to vector<32x32xf32>
    %cst_10 = arith.constant dense<0.000000e+00> : vector<8x32xf32>
    %12 = tpu.matmul %9, %11, %cst_10 {dimension_numbers = #tpu.dot_dimension_numbers<[1], [0], [0], [1], [0, 0, 1, 1], [], []>} : vector<8x32xf32>, vector<32x32xf32>, vector<8x32xf32> -> vector<8x32xf32>
    %c1_11 = arith.constant 1 : index
    %c0_12 = arith.constant 0 : index
    %c0_13 = arith.constant 0 : index
    %13 = vector.load %arg3[%c1_11, %c0_12, %c0_13] : memref<2x1x32xf32, #tpu.memory_space<vmem>>, vector<1x1x32xf32>
    %14 = vector.shape_cast %13 : vector<1x1x32xf32> to vector<1x32xf32>
    %15 = vector.broadcast %14 : vector<1x32xf32> to vector<8x32xf32>
    %16 = arith.addf %12, %15 : vector<8x32xf32>
    %cst_14 = arith.constant 0.000000e+00 : f32
    %17 = vector.broadcast %cst_14 : f32 to vector<8x32xf32>
    %18 = arith.maximumf %16, %17 : vector<8x32xf32>
    %c0_15 = arith.constant 0 : index
    %c0_16 = arith.constant 0 : index
    %19 = vector.load %arg4[%c0_15, %c0_16] : memref<32x128xf32, #tpu.memory_space<vmem>>, vector<32x128xf32>
    %cst_17 = arith.constant dense<0.000000e+00> : vector<8x128xf32>
    %20 = tpu.matmul %18, %19, %cst_17 {dimension_numbers = #tpu.dot_dimension_numbers<[1], [0], [0], [1], [0, 0, 1, 1], [], []>} : vector<8x32xf32>, vector<32x128xf32>, vector<8x128xf32> -> vector<8x128xf32>
    %c0_18 = arith.constant 0 : index
    %c0_19 = arith.constant 0 : index
    %21 = vector.load %arg5[%c0_18, %c0_19] : memref<1x128xf32, #tpu.memory_space<vmem>>, vector<1x128xf32>
    %22 = vector.broadcast %21 : vector<1x128xf32> to vector<8x128xf32>
    %23 = arith.addf %20, %22 : vector<8x128xf32>
    %cst_20 = arith.constant dense<0xFF800000> : vector<8xf32>
    %24 = vector.multi_reduction <maximumf>, %23, %cst_20 [1] : vector<8x128xf32> to vector<8xf32>
    %25 = vector.shape_cast %24 : vector<8xf32> to vector<8x1xf32>
    %26 = vector.broadcast %25 : vector<8x1xf32> to vector<8x128xf32>
    %27 = arith.subf %23, %26 : vector<8x128xf32>
    %28 = math.exp %27 : vector<8x128xf32>
    %cst_21 = arith.constant dense<0.000000e+00> : vector<8xf32>
    %29 = vector.multi_reduction <add>, %28, %cst_21 [1] : vector<8x128xf32> to vector<8xf32>
    %30 = vector.shape_cast %29 : vector<8xf32> to vector<8x1xf32>
    %31 = math.log %30 : vector<8x1xf32>
    %32 = vector.broadcast %31 : vector<8x1xf32> to vector<8x128xf32>
    %33 = arith.subf %27, %32 : vector<8x128xf32>
    %c0_22 = arith.constant 0 : index
    %c0_23 = arith.constant 0 : index
    %34 = vector.load %arg6[%c0_22, %c0_23] : memref<8x128xf32, #tpu.memory_space<vmem>>, vector<8x128xf32>
    tpu.vector_store %arg6[%c0_22, %c0_23], %33 {strides = array<i32>} : memref<8x128xf32, #tpu.memory_space<vmem>>, vector<8x128xf32>,
    return
  }
  func.func @transform_0(%arg0: i32) -> (i32, i32) {
    %c0_i32 = arith.constant 0 : i32
    %c0_i32_0 = arith.constant 0 : i32
    return %arg0, %c0_i32 : i32, i32
  }
  func.func @transform_1(%arg0: i32) -> (i32, i32, i32) {
    %c0_i32 = arith.constant 0 : i32
    %c0_i32_0 = arith.constant 0 : i32
    %c0_i32_1 = arith.constant 0 : i32
    %c0_i32_2 = arith.constant 0 : i32
    return %c0_i32, %c0_i32_0, %c0_i32_1 : i32, i32, i32
  }
  func.func @transform_2(%arg0: i32) -> (i32, i32, i32) {
    %c0_i32 = arith.constant 0 : i32
    %c0_i32_0 = arith.constant 0 : i32
    %c0_i32_1 = arith.constant 0 : i32
    %c0_i32_2 = arith.constant 0 : i32
    return %c0_i32, %c0_i32_0, %c0_i32_1 : i32, i32, i32
  }
  func.func @transform_3(%arg0: i32) -> (i32, i32) {
    %c0_i32 = arith.constant 0 : i32
    %c0_i32_0 = arith.constant 0 : i32
    %c0_i32_1 = arith.constant 0 : i32
    return %c0_i32, %c0_i32_0 : i32, i32
  }
  func.func @transform_4(%arg0: i32) -> (i32, i32) {
    %c0_i32 = arith.constant 0 : i32
    %c0_i32_0 = arith.constant 0 : i32
    %c0_i32_1 = arith.constant 0 : i32
    return %c0_i32, %c0_i32_0 : i32, i32
  }
  func.func @transform_5(%arg0: i32) -> (i32, i32) {
    %c0_i32 = arith.constant 0 : i32
    %c0_i32_0 = arith.constant 0 : i32
    return %arg0, %c0_i32 : i32, i32
  }
}

</mosaic_0001>

<bundles_post_ra>
// kernel: tpu_custom_call.1
= control target key start
LH: loop header
LB: loop body
LE: loop exit
PB: predicated region body
PF: predicated region fallthrough
CT: control target
= control target key end

     0   :  { %10 = vsyncpa [#allocation3], 0  ;;  %s633_s0 = inlined_call_operand.hbm [shape: f32[8,32], index: 0, kind: input, shape index: {}]   ;;  %s634_s1 = inlined_call_operand.hbm [shape: f32[2,32,32], index: 1, kind: input, shape index: {}]   ;;  %s635_s2 = inlined_call_operand.vmem [shape: f32[2,1,32], index: 2, kind: input, shape index: {}]   ;;  %s636_s3 = inlined_call_operand.hbm [shape: f32[32,128], index: 3, kind: input, shape index: {}]   ;;  %s637_s4 = inlined_call_operand.vmem [shape: f32[1,128], index: 4, kind: input, shape index: {}]   ;;  %s638_s5 = inlined_call_operand.hbm [shape: f32[8,128], index: 5, kind: output, shape index: {}]  }
   0x1   :  { %11 = vsyncpa [#allocation6], 0 }
   0x2   :  { %12 = vsyncpa [#allocation4], 0  ;;  %s525_s18 = smov [#allocation5]   ;;  %s431_s22 = scalar_lea.hbm %s634_s1, 1024 }
   0x3   :  { %s28_s19 = sshll.u32 %s525_s18, 4  ;;  %p432_p0 = scmp.ne.s32.totalorder %s634_s1, %s431_s22  ;;  %s29_s19 = int_to_ptr.vmem [resolvable:$true] %s28_s19 }
   0x4   :  { %p435_p1 = scmp.lt.u32.totalorder %s431_s22, %s634_s1 }
   0x6   :  { %p437_p2 = pnand %p435_p1, %p432_p0 }
   0x8   :  { %440 = shalt.err (!%p437_p2)
}
   0x9   :  { %s441_s27 = scalar_lea.vmem %s29_s19, 1024  ;;  %p446_p4 = scmp.lt.s32.totalorder %s29_s19, %s29_s19 }
   0xa   :  { %p442_p3 = scmp.ne.s32.totalorder %s29_s19, %s441_s27  ;;  %p447_p5 = scmp.lt.s32.totalorder %s441_s27, %s441_s27 }
   0xc   :  { %p448_p6 = por %p447_p5, %p446_p4 }
   0xe   :  { %p449_p7 = pnand %p448_p6, %p442_p3 }
  0x10   :  { %452 = shalt.err (!%p449_p7)
}
  0x11   :  { %s526_s28 = smov 128   ;;  %s527_s29 = smov 8  }
  0x12   :  { %34 = dma.hbm_to_vmem [thread:$0]  %s634_s1, 1024, %s29_s19, [#allocation6], %s526_s28, %s526_s28, %s527_s29  }
  0x13   :  { %s528_s7 = smov [#allocation2]   ;;  %s529_s9 = smov [#allocation7]  }
  0x14   :  { %s19_s8 = sshll.u32 %s528_s7, 4  ;;  %s42_s10 = sshll.u32 %s529_s9, 4  ;;  %s20_s8 = int_to_ptr.vmem [resolvable:$true] %s19_s8  ;;  %s43_s10 = int_to_ptr.vmem [resolvable:$true] %s42_s10 }
  0x15   :  { %s453_s13 = scalar_lea.hbm %s633_s0, 128 }
  0x16   :  { %p454_p8 = scmp.ne.s32.totalorder %s633_s0, %s453_s13  ;;  %p457_p9 = scmp.lt.u32.totalorder %s453_s13, %s633_s0 }
  0x18   :  { %p459_p10 = pnand %p457_p9, %p454_p8 }
  0x1a   :  { %462 = shalt.err (!%p459_p10)
}
  0x1b   :  { %s463_s1 = scalar_lea.vmem %s20_s8, 128  ;;  %p468_p12 = scmp.lt.s32.totalorder %s20_s8, %s20_s8 }
  0x1c   :  { %p464_p11 = scmp.ne.s32.totalorder %s20_s8, %s463_s1  ;;  %p469_p13 = scmp.lt.s32.totalorder %s463_s1, %s463_s1 }
  0x1e   :  { %p470_p0 = por %p469_p13, %p468_p12 }
  0x20   :  { %p471_p1 = pnand %p470_p0, %p464_p11 }
  0x22   :  { %474 = shalt.err (!%p471_p1)
}
  0x23   :  { %22 = dma.hbm_to_vmem [thread:$0]  %s633_s0, 128, %s20_s8, [#allocation3]  }
  0x24   :  { %s475_s22 = scalar_lea.hbm %s636_s3, 512 }
  0x25   :  { %p476_p2 = scmp.ne.s32.totalorder %s636_s3, %s475_s22  ;;  %p479_p3 = scmp.lt.u32.totalorder %s475_s22, %s636_s3 }
  0x27   :  { %p481_p4 = pnand %p479_p3, %p476_p2 }
  0x29   :  { %484 = shalt.err (!%p481_p4)
}
  0x2a   :  { %s485_s27 = scalar_lea.vmem %s43_s10, 512  ;;  %p490_p6 = scmp.lt.s32.totalorder %s43_s10, %s43_s10 }
  0x2b   :  { %p486_p5 = scmp.ne.s32.totalorder %s43_s10, %s485_s27  ;;  %p491_p7 = scmp.lt.s32.totalorder %s485_s27, %s485_s27 }
  0x2d   :  { %p492_p8 = por %p491_p7, %p490_p6 }
  0x2f   :  { %p493_p9 = pnand %p492_p8, %p486_p5 }
  0x31   :  { %496 = shalt.err (!%p493_p9)
}
  0x32   :  { %48 = dma.hbm_to_vmem [thread:$0]  %s636_s3, 512, %s43_s10, [#allocation6], %s526_s28, %s526_s28, %s527_s29  }
  0x33   :  { %519 = dma.done.wait [#allocation3], 128  }
  0x34   :  { %520 = vsyncadd [#allocation3], 4294967168 }
  0x35   :  { %521 = dma.done.wait [#allocation6], 1536  }
  0x36   :  { %522 = vsyncadd [#allocation6], 4294965760  ;;  %v530_v0 = vmov 0.0|0.0   ;;  %vm531_vm0 = vmmov 0   ;;  %v532_v1 = vmov 0.0   ;;  %v61_v2 = vld [vmem:[#allocation5] sm:$0xff] }
  0x37   :  { %400 = vmatprep.subr.bf16.mxu0 %v530_v0  ;;  %375 = vmatprep.mubr.msk.f32.mxu0 %vm531_vm0, %v532_v1  ;;  %v62_v3 = vld [vmem:[#allocation5 + $0x8] sm:$0xff]  ;;  %v63_v4 = vld [vmem:[#allocation5 + $0x10] sm:$0xff]  ;;  %v64_v6 = vld [vmem:[#allocation5 + $0x18] sm:$0xff]  ;;  %vm72_vm1 = vcmask 261120  }
  0x38   :  { %406 = vmatprep.subr.bf16.mxu1 %v530_v0  ;;  %386 = vmatprep.mubr.msk.f32.mxu1 %vm531_vm0, %v532_v1  ;;  %v401_v5 = vpack.c.bf16 %v62_v3, %v61_v2  ;;  %v148_v7 = vld [vmem:[#allocation5 + $0x20] sm:$0xff]  ;;  %v149_v8 = vld [vmem:[#allocation5 + $0x28] sm:$0xff]  ;;  %v404_v9 = vpack.c.bf16 %v64_v6, %v63_v4  ;;  %v60_v11 = vld [vmem:[#allocation2] sm:$0xff] }
  0x39   :  { %v407_v10 = vpack.c.bf16 %v149_v8, %v148_v7  ;;  %v150_v12 = vld [vmem:[#allocation5 + $0x30] sm:$0xff]  ;;  %v151_v13 = vld [vmem:[#allocation5 + $0x38] sm:$0xff]  ;;  %v234_v15 = vld [vmem:[#allocation7] sm:$0xff] }
  0x3a   :  { %402 = vmatpush3.bf16.msra.mxu0 %v401_v5  ;;  %v410_v14 = vpack.c.bf16 %v151_v13, %v150_v12  ;;  %v235_v16 = vld [vmem:[#allocation7 + $0x8] sm:$0xff]  ;;  %v345_v18 = vld [vmem:[%s635_s2] ss:$0 sm:$0xff]  ;;  %v236_v23 = vld [vmem:[#allocation7 + $0x10] sm:$0xff] }
  0x3b   :  { %403 = vmatprep.subr.bf16.mxu0 %v530_v0  ;;  %408 = vmatpush3.bf16.msra.mxu1 %v407_v10  ;;  %v413_v17 = vpack.c.bf16 %v235_v16, %v234_v15  ;;  %v237_v24 = vld [vmem:[#allocation7 + $0x18] sm:$0xff] }
  0x3c   :  { %409 = vmatprep.subr.bf16.mxu1 %v530_v0  ;;  %v416_v25 = vpack.c.bf16 %v237_v24, %v236_v23  ;;  %v348_v26 = vld [vmem:[%s635_s2 + $0x1] ss:$0 sm:$0xff]  ;;  %v350_v31 = vld [vmem:[%s637_s4] ss:$0 sm:$0xff]  ;;  %s533_s2 = smov [#allocation8]  }
  0x3d   :  { %s335_s9 = sshll.u32 %s533_s2, 4  ;;  %s336_s9 = int_to_ptr.vmem [resolvable:$true] %s335_s9 }
  0x3e   :  { %405 = vmatpush3.bf16.msra.mxu0 %v404_v9  ;;  %s497_s4 = scalar_lea.vmem %s336_s9, 128  ;;  %p502_p11 = scmp.lt.s32.totalorder %s336_s9, %s336_s9 }
  0x3f   :  { %412 = vmatprep.subr.bf16.mxu0 %v530_v0  ;;  %411 = vmatpush3.bf16.msra.mxu1 %v410_v14  ;;  %p498_p10 = scmp.ne.s32.totalorder %s336_s9, %s497_s4  ;;  %p503_p12 = scmp.lt.s32.totalorder %s497_s4, %s497_s4 }
  0x41   :  { %376 = vmatmul.mubr.msk.f32.vlgmr.msra.gmra.mrb[0].mxu0 %vm72_vm1, %v60_v11  ;;  %p504_p13 = por %p503_p12, %p502_p11 }
  0x42   :  { %397 = vmatprep.mubr.msk.f32.mxu0 %vm531_vm0, %v532_v1  ;;  %414 = vmatpush3.bf16.msra.mxu0 %v413_v17 }
  0x43   :  { %415 = vmatprep.subr.bf16.mxu0 %v530_v0  ;;  %p505_p0 = pnand %p504_p13, %p498_p10 }
  0x46   :  { %417 = vmatpush3.bf16.msra.mxu0 %v416_v25 }
 0x114   :  { %v142_v19 = vpop.f32.mrb[0].mxu0 }
 0x115   :  { %v143_v20 = vadd.f32 %v345_v18, %v142_v19  ;;  %v377_v21 = vpop.f32.mrb[1].mxu0 }
 0x117   :  { %v146_v22 = vmax.f32 %v143_v20, 0.0 }
 0x119   :  { %387 = vmatmul.mubr.msk.f32.vlgmr.msra.gmra.mrb[0].mxu1 %vm72_vm1, %v146_v22 }
 0x1ec   :  { %v229_v27 = vpop.f32.mrb[0].mxu1 }
 0x1ed   :  { %v230_v28 = vadd.f32 %v348_v26, %v229_v27  ;;  %v388_v29 = vpop.f32.mrb[1].mxu1 }
 0x1ef   :  { %v233_v30 = vmax.f32 %v230_v28, 0.0 }
 0x1f1   :  { %398 = vmatmul.mubr.msk.f32.vlgmr.msra.gmra.mrb[2].mxu0 %vm72_vm1, %v233_v30 }
 0x2c4   :  { %v314_v32 = vpop.f32.mrb[2].mxu0 }
 0x2c5   :  { %v315_v33 = vadd.f32 %v350_v31, %v314_v32  ;;  %v399_v34 = vpop.f32.mrb[3].mxu0 }
 0x2c7   :  { %318 = vmax.xlane.f32.xlu0 %v315_v33 }
 0x354   :  { %v319_v35 = vpop.xlane.xlu0 %318 }
 0x355   :  { %v320_v36 = vsub.f32 %v315_v33, %v319_v35 }
 0x357   :  { %v321_v37 = vmul.f32 1.442695, %v320_v36 }
 0x359   :  { %427 = vpow2.f32 %v321_v37 }
 0x363   :  { %v428_v38 = vpop.eup %427 }
 0x364   :  { %323 = vadd.xlane.f32.xlu0 %v428_v38 }
 0x3f1   :  { %v324_v39 = vpop.xlane.xlu0 %323 }
 0x3f2   :  { %429 = vlog2.f32 %v324_v39 }
 0x3fc   :  { %v430_v40 = vpop.eup %429 }
 0x3fd   :  { %v326_v41 = vmul.f32 0.6931472, %v430_v40 }
 0x3ff   :  { %v327_v42 = vsub.f32 %v320_v36, %v326_v41 }
 0x401   :  { %328 = vst [vmem:[#allocation8] sm:$0xff] %v327_v42 }
 0x402   :  { %508 = shalt.err (!%p505_p0)
}
 0x403   :  { %s509_s12 = scalar_lea.hbm %s638_s5, 128 }
 0x404   :  { %p510_p1 = scmp.ne.s32.totalorder %s638_s5, %s509_s12  ;;  %p513_p2 = scmp.lt.u32.totalorder %s509_s12, %s638_s5 }
 0x406   :  { %p515_p3 = pnand %p513_p2, %p510_p1 }
 0x408   :  { %518 = shalt.err (!%p515_p3)
}
 0x409   :  { %338 = dma.vmem_to_hbm [thread:$0]  %s336_s9, 128, %s638_s5, [#allocation4]  }
 0x40a   :  { %523 = dma.done.wait [#allocation4], 128  }
 0x40b   :  { %524 = vsyncadd [#allocation4], 4294967168 }
 0x40c   :  { %342 = vsyncpa [#allocation3], 1 }
 0x40d   :  { %343 = vsyncpa [#allocation6], 1 }
 0x40e   :  { %344 = vsyncpa [#allocation4], 1 }

// kernel: tpu_custom_call.1
= control target key start
LH: loop header
LB: loop body
LE: loop exit
PB: predicated region body
PF: predicated region fallthrough
CT: control target
= control target key end

     0   :  { %10 = vsyncpa [#allocation3], 0  ;;  %s633_s0 = inlined_call_operand.hbm [shape: f32[8,32], index: 0, kind: input, shape index: {}]   ;;  %s634_s1 = inlined_call_operand.hbm [shape: f32[2,32,32], index: 1, kind: input, shape index: {}]   ;;  %s635_s2 = inlined_call_operand.vmem [shape: f32[2,1,32], index: 2, kind: input, shape index: {}]   ;;  %s636_s3 = inlined_call_operand.hbm [shape: f32[32,128], index: 3, kind: input, shape index: {}]   ;;  %s637_s4 = inlined_call_operand.vmem [shape: f32[1,128], index: 4, kind: input, shape index: {}]   ;;  %s638_s5 = inlined_call_operand.hbm [shape: f32[8,128], index: 5, kind: output, shape index: {}]  }
   0x1   :  { %11 = vsyncpa [#allocation6], 0 }
   0x2   :  { %12 = vsyncpa [#allocation4], 0  ;;  %s525_s18 = smov [#allocation5]   ;;  %s431_s22 = scalar_lea.hbm %s634_s1, 1024 }
   0x3   :  { %s28_s19 = sshll.u32 %s525_s18, 4  ;;  %p432_p0 = scmp.ne.s32.totalorder %s634_s1, %s431_s22  ;;  %s29_s19 = int_to_ptr.vmem [resolvable:$true] %s28_s19 }
   0x4   :  { %p435_p1 = scmp.lt.u32.totalorder %s431_s22, %s634_s1 }
   0x6   :  { %p437_p2 = pnand %p435_p1, %p432_p0 }
   0x8   :  { %440 = shalt.err (!%p437_p2)
}
   0x9   :  { %s441_s27 = scalar_lea.vmem %s29_s19, 1024  ;;  %p446_p4 = scmp.lt.s32.totalorder %s29_s19, %s29_s19 }
   0xa   :  { %p442_p3 = scmp.ne.s32.totalorder %s29_s19, %s441_s27  ;;  %p447_p5 = scmp.lt.s32.totalorder %s441_s27, %s441_s27 }
   0xc   :  { %p448_p6 = por %p447_p5, %p446_p4 }
   0xe   :  { %p449_p7 = pnand %p448_p6, %p442_p3 }
  0x10   :  { %452 = shalt.err (!%p449_p7)
}
  0x11   :  { %s526_s28 = smov 128   ;;  %s527_s29 = smov 8  }
  0x12   :  { %34 = dma.hbm_to_vmem [thread:$0]  %s634_s1, 1024, %s29_s19, [#allocation6], %s526_s28, %s526_s28, %s527_s29  }
  0x13   :  { %s528_s7 = smov [#allocation2]   ;;  %s529_s9 = smov [#allocation7]  }
  0x14   :  { %s19_s8 = sshll.u32 %s528_s7, 4  ;;  %s42_s10 = sshll.u32 %s529_s9, 4  ;;  %s20_s8 = int_to_ptr.vmem [resolvable:$true] %s19_s8  ;;  %s43_s10 = int_to_ptr.vmem [resolvable:$true] %s42_s10 }
  0x15   :  { %s453_s13 = scalar_lea.hbm %s633_s0, 128 }
  0x16   :  { %p454_p8 = scmp.ne.s32.totalorder %s633_s0, %s453_s13  ;;  %p457_p9 = scmp.lt.u32.totalorder %s453_s13, %s633_s0 }
  0x18   :  { %p459_p10 = pnand %p457_p9, %p454_p8 }
  0x1a   :  { %462 = shalt.err (!%p459_p10)
}
  0x1b   :  { %s463_s1 = scalar_lea.vmem %s20_s8, 128  ;;  %p468_p12 = scmp.lt.s32.totalorder %s20_s8, %s20_s8 }
  0x1c   :  { %p464_p11 = scmp.ne.s32.totalorder %s20_s8, %s463_s1  ;;  %p469_p13 = scmp.lt.s32.totalorder %s463_s1, %s463_s1 }
  0x1e   :  { %p470_p0 = por %p469_p13, %p468_p12 }
  0x20   :  { %p471_p1 = pnand %p470_p0, %p464_p11 }
  0x22   :  { %474 = shalt.err (!%p471_p1)
}
  0x23   :  { %22 = dma.hbm_to_vmem [thread:$0]  %s633_s0, 128, %s20_s8, [#allocation3]  }
  0x24   :  { %s475_s22 = scalar_lea.hbm %s636_s3, 512 }
  0x25   :  { %p476_p2 = scmp.ne.s32.totalorder %s636_s3, %s475_s22  ;;  %p479_p3 = scmp.lt.u32.totalorder %s475_s22, %s636_s3 }
  0x27   :  { %p481_p4 = pnand %p479_p3, %p476_p2 }
  0x29   :  { %484 = shalt.err (!%p481_p4)
}
  0x2a   :  { %s485_s27 = scalar_lea.vmem %s43_s10, 512  ;;  %p490_p6 = scmp.lt.s32.totalorder %s43_s10, %s43_s10 }
  0x2b   :  { %p486_p5 = scmp.ne.s32.totalorder %s43_s10, %s485_s27  ;;  %p491_p7 = scmp.lt.s32.totalorder %s485_s27, %s485_s27 }
  0x2d   :  { %p492_p8 = por %p491_p7, %p490_p6 }
  0x2f   :  { %p493_p9 = pnand %p492_p8, %p486_p5 }
  0x31   :  { %496 = shalt.err (!%p493_p9)
}
  0x32   :  { %48 = dma.hbm_to_vmem [thread:$0]  %s636_s3, 512, %s43_s10, [#allocation6], %s526_s28, %s526_s28, %s527_s29  }
  0x33   :  { %519 = dma.done.wait [#allocation3], 128  }
  0x34   :  { %520 = vsyncadd [#allocation3], 4294967168 }
  0x35   :  { %521 = dma.done.wait [#allocation6], 1536  }
  0x36   :  { %522 = vsyncadd [#allocation6], 4294965760  ;;  %v530_v0 = vmov 0.0|0.0   ;;  %vm531_vm0 = vmmov 0   ;;  %v532_v1 = vmov 0.0   ;;  %v61_v2 = vld [vmem:[#allocation5] sm:$0xff] }
  0x37   :  { %400 = vmatprep.subr.bf16.mxu0 %v530_v0  ;;  %375 = vmatprep.mubr.msk.f32.mxu0 %vm531_vm0, %v532_v1  ;;  %v62_v3 = vld [vmem:[#allocation5 + $0x8] sm:$0xff]  ;;  %v63_v4 = vld [vmem:[#allocation5 + $0x10] sm:$0xff]  ;;  %v64_v6 = vld [vmem:[#allocation5 + $0x18] sm:$0xff]  ;;  %vm72_vm1 = vcmask 261120  }
  0x38   :  { %406 = vmatprep.subr.bf16.mxu1 %v530_v0  ;;  %386 = vmatprep.mubr.msk.f32.mxu1 %vm531_vm0, %v532_v1  ;;  %v401_v5 = vpack.c.bf16 %v62_v3, %v61_v2  ;;  %v148_v7 = vld [vmem:[#allocation5 + $0x20] sm:$0xff]  ;;  %v149_v8 = vld [vmem:[#allocation5 + $0x28] sm:$0xff]  ;;  %v404_v9 = vpack.c.bf16 %v64_v6, %v63_v4  ;;  %v60_v11 = vld [vmem:[#allocation2] sm:$0xff] }
  0x39   :  { %v407_v10 = vpack.c.bf16 %v149_v8, %v148_v7  ;;  %v150_v12 = vld [vmem:[#allocation5 + $0x30] sm:$0xff]  ;;  %v151_v13 = vld [vmem:[#allocation5 + $0x38] sm:$0xff]  ;;  %v234_v15 = vld [vmem:[#allocation7] sm:$0xff] }
  0x3a   :  { %402 = vmatpush3.bf16.msra.mxu0 %v401_v5  ;;  %v410_v14 = vpack.c.bf16 %v151_v13, %v150_v12  ;;  %v235_v16 = vld [vmem:[#allocation7 + $0x8] sm:$0xff]  ;;  %v345_v18 = vld [vmem:[%s635_s2] ss:$0 sm:$0xff]  ;;  %v236_v23 = vld [vmem:[#allocation7 + $0x10] sm:$0xff] }
  0x3b   :  { %403 = vmatprep.subr.bf16.mxu0 %v530_v0  ;;  %408 = vmatpush3.bf16.msra.mxu1 %v407_v10  ;;  %v413_v17 = vpack.c.bf16 %v235_v16, %v234_v15  ;;  %v237_v24 = vld [vmem:[#allocation7 + $0x18] sm:$0xff] }
  0x3c   :  { %409 = vmatprep.subr.bf16.mxu1 %v530_v0  ;;  %v416_v25 = vpack.c.bf16 %v237_v24, %v236_v23  ;;  %v348_v26 = vld [vmem:[%s635_s2 + $0x1] ss:$0 sm:$0xff]  ;;  %v350_v31 = vld [vmem:[%s637_s4] ss:$0 sm:$0xff]  ;;  %s533_s2 = smov [#allocation8]  }
  0x3d   :  { %s335_s9 = sshll.u32 %s533_s2, 4  ;;  %s336_s9 = int_to_ptr.vmem [resolvable:$true] %s335_s9 }
  0x3e   :  { %405 = vmatpush3.bf16.msra.mxu0 %v404_v9  ;;  %s497_s4 = scalar_lea.vmem %s336_s9, 128  ;;  %p502_p11 = scmp.lt.s32.totalorder %s336_s9, %s336_s9 }
  0x3f   :  { %412 = vmatprep.subr.bf16.mxu0 %v530_v0  ;;  %411 = vmatpush3.bf16.msra.mxu1 %v410_v14  ;;  %p498_p10 = scmp.ne.s32.totalorder %s336_s9, %s497_s4  ;;  %p503_p12 = scmp.lt.s32.totalorder %s497_s4, %s497_s4 }
  0x41   :  { %376 = vmatmul.mubr.msk.f32.vlgmr.msra.gmra.mrb[0].mxu0 %vm72_vm1, %v60_v11  ;;  %p504_p13 = por %p503_p12, %p502_p11 }
  0x42   :  { %397 = vmatprep.mubr.msk.f32.mxu0 %vm531_vm0, %v532_v1  ;;  %414 = vmatpush3.bf16.msra.mxu0 %v413_v17 }
  0x43   :  { %415 = vmatprep.subr.bf16.mxu0 %v530_v0  ;;  %p505_p0 = pnand %p504_p13, %p498_p10 }
  0x46   :  { %417 = vmatpush3.bf16.msra.mxu0 %v416_v25 }
 0x114   :  { %v142_v19 = vpop.f32.mrb[0].mxu0 }
 0x115   :  { %v143_v20 = vadd.f32 %v345_v18, %v142_v19  ;;  %v377_v21 = vpop.f32.mrb[1].mxu0 }
 0x117   :  { %v146_v22 = vmax.f32 %v143_v20, 0.0 }
 0x119   :  { %387 = vmatmul.mubr.msk.f32.vlgmr.msra.gmra.mrb[0].mxu1 %vm72_vm1, %v146_v22 }
 0x1ec   :  { %v229_v27 = vpop.f32.mrb[0].mxu1 }
 0x1ed   :  { %v230_v28 = vadd.f32 %v348_v26, %v229_v27  ;;  %v388_v29 = vpop.f32.mrb[1].mxu1 }
 0x1ef   :  { %v233_v30 = vmax.f32 %v230_v28, 0.0 }
 0x1f1   :  { %398 = vmatmul.mubr.msk.f32.vlgmr.msra.gmra.mrb[2].mxu0 %vm72_vm1, %v233_v30 }
 0x2c4   :  { %v314_v32 = vpop.f32.mrb[2].mxu0 }
 0x2c5   :  { %v315_v33 = vadd.f32 %v350_v31, %v314_v32  ;;  %v399_v34 = vpop.f32.mrb[3].mxu0 }
 0x2c7   :  { %318 = vmax.xlane.f32.xlu0 %v315_v33 }
 0x354   :  { %v319_v35 = vpop.xlane.xlu0 %318 }
 0x355   :  { %v320_v36 = vsub.f32 %v315_v33, %v319_v35 }
 0x357   :  { %v321_v37 = vmul.f32 1.442695, %v320_v36 }
 0x359   :  { %427 = vpow2.f32 %v321_v37 }
 0x363   :  { %v428_v38 = vpop.eup %427 }
 0x364   :  { %323 = vadd.xlane.f32.xlu0 %v428_v38 }
 0x3f1   :  { %v324_v39 = vpop.xlane.xlu0 %323 }
 0x3f2   :  { %429 = vlog2.f32 %v324_v39 }
 0x3fc   :  { %v430_v40 = vpop.eup %429 }
 0x3fd   :  { %v326_v41 = vmul.f32 0.6931472, %v430_v40 }
 0x3ff   :  { %v327_v42 = vsub.f32 %v320_v36, %v326_v41 }
 0x401   :  { %328 = vst [vmem:[#allocation8] sm:$0xff] %v327_v42 }
 0x402   :  { %508 = shalt.err (!%p505_p0)
}
 0x403   :  { %s509_s12 = scalar_lea.hbm %s638_s5, 128 }
 0x404   :  { %p510_p1 = scmp.ne.s32.totalorder %s638_s5, %s509_s12  ;;  %p513_p2 = scmp.lt.u32.totalorder %s509_s12, %s638_s5 }
 0x406   :  { %p515_p3 = pnand %p513_p2, %p510_p1 }
 0x408   :  { %518 = shalt.err (!%p515_p3)
}
 0x409   :  { %338 = dma.vmem_to_hbm [thread:$0]  %s336_s9, 128, %s638_s5, [#allocation4]  }
 0x40a   :  { %523 = dma.done.wait [#allocation4], 128  }
 0x40b   :  { %524 = vsyncadd [#allocation4], 4294967168 }
 0x40c   :  { %342 = vsyncpa [#allocation3], 1 }
 0x40d   :  { %343 = vsyncpa [#allocation6], 1 }
 0x40e   :  { %344 = vsyncpa [#allocation4], 1 }

</bundles_post_ra>
